<compile_context>
chip_gen: v7x
topology: tpu7x:2x2x1
jax: 0.10.0
libtpu: 0.0.40
codegen_flags: <defaults>
</compile_context>

<pallas_src>
import functools

import jax
import jax.numpy as jnp
from jax import lax
from jax.experimental import pallas as pl
from jax.experimental.pallas import tpu as pltpu

LANE = 128                               # accumulator lane width / chunk width
TS_MIN = 1024                            # keep contiguous DMA runs >= 1024 elems (2-4 KiB)
TARGET_BLOCK_BYTES = 8 * 1024 * 1024     # per-buffer x block target (all generations)
MAX_BLOCK_BYTES = 12 * 1024 * 1024       # cap: 2x double-buffered blocks fit v7x's 64 MiB
UNROLL_LIMIT = 16                        # fully unroll the chunk loop below this count


def _accumulate(x_ref, acc_ref, width):
    """acc_ref += per-lane partial sums of x_ref[:, :, :width] (f32, pure VPU adds)."""
    n_full = width // LANE
    tail = width % LANE

    if 0 < n_full <= UNROLL_LIMIT:
        for j in range(n_full):
            acc_ref[...] += x_ref[:, :, j * LANE:(j + 1) * LANE].astype(jnp.float32)
    elif n_full > UNROLL_LIMIT:
        def body(j, carry):
            off = pl.multiple_of(j * LANE, LANE)
            acc_ref[...] += x_ref[:, :, pl.ds(off, LANE)].astype(jnp.float32)
            return carry
        lax.fori_loop(0, n_full, body, 0, unroll=4)

    if tail:
        start = n_full * LANE
        acc_ref[:, :, :tail] += x_ref[:, :, start:start + tail].astype(jnp.float32)


def gap_linear_kernel(x_ref, w_ref, b_ref, o_ref, acc_ref, *, S, TS, NS):
    # x_ref:   (TN, C, TS)   native dtype, streamed over the S grid axis
    # w_ref:   (C, O_pad)    f32, carries the 1/S mean scale
    # b_ref:   (1, O_pad)    f32
    # o_ref:   (1, TN, O_pad)
    # acc_ref: (TN, C, LANE) f32 scratch, persists across S steps
    s = pl.program_id(1)

    @pl.when(s == 0)
    def _():
        acc_ref[...] = jnp.zeros_like(acc_ref)

    last_width = S - (NS - 1) * TS            # static: valid lanes in the final S block

    if last_width == TS:
        # TS divides S: every step accumulates the full block, no masking anywhere.
        _accumulate(x_ref, acc_ref, TS)
    else:
        # Unmasked fast path for all but the last step; the last step only touches the
        # statically known valid prefix (no iota/where mask on any step).
        @pl.when(s < NS - 1)
        def _():
            _accumulate(x_ref, acc_ref, TS)

        @pl.when(s == NS - 1)
        def _():
            _accumulate(x_ref, acc_ref, last_width)

    @pl.when(s == NS - 1)
    def _():
        # Single cross-lane reduce per batch block (XLU work only in the epilogue).
        pooled = jnp.sum(acc_ref[...], axis=-1)                        # (TN, C) f32
        y = jnp.dot(pooled, w_ref[...],
                    preferred_element_type=jnp.float32) + b_ref[...]   # (TN, O_pad)
        o_ref[...] = y[None].astype(o_ref.dtype)


def gap_linear(x_ncdhw, weight_oc, bias_o):
    """GAPLinear forward (prompt=None): mean over (D,H,W) then Linear(C -> O).

    x_ncdhw: (N, C, D, H, W); weight_oc: (O, C) (PyTorch layout); bias_o: (O,).
    Output dtype follows x (for bf16 inputs the result is bf16, a documented
    precision-only divergence from an fp32 reference).
    """
    N, C, D, H, W = x_ncdhw.shape
    O = weight_oc.shape[0]
    S = D * H * W
    itemsize = jnp.dtype(x_ncdhw.dtype).itemsize

    # Free view of NCDHW (contiguous trailing dims merged) -> no HBM transpose.
    x_ncs = x_ncdhw.reshape(N, C, S)

    # Fold 1/S into the (tiny) weight; pad O to a lane-dense multiple of 128 so the
    # output store is an unmasked, lane-dense vst.
    O_pad = ((O + LANE - 1) // LANE) * LANE
    w_co = jnp.transpose(weight_oc, (1, 0)).astype(jnp.float32) * (1.0 / S)   # (C, O)
    w_co = jnp.pad(w_co, ((0, 0), (0, O_pad - O)))                            # (C, O_pad)
    b_1o = jnp.pad(bias_o.astype(jnp.float32).reshape(1, O),
                   ((0, 0), (0, O_pad - O)))                                  # (1, O_pad)

    # ---- Batch tile: keep the "parallel" axis >= 2 blocks whenever N >= 2 so both v7x
    # TensorCores (and their HBM share) get work.  Ragged last block is safe: there is
    # no cross-row coupling and padded rows are sliced off after the call.
    if N >= 16:
        TN = 8
    elif N >= 2:
        TN = (N + 1) // 2
    else:
        TN = 1
    # TODO(synk): for N == 1 on v7x, splitting the S reduction across the two
    # TensorCores (per-core partial accumulators + combine) would be needed to use both.

    # ---- Spatial tile: prefer full-S blocks; otherwise shrink TN (down to 1) before
    # letting the innermost contiguous DMA run (TS) fall below TS_MIN, then size TS to
    # ~TARGET_BLOCK_BYTES (cap MAX_BLOCK_BYTES), rounded down to a multiple of 128 lanes.
    row_bytes = C * itemsize

    def ts_budget(tn, budget):
        return budget // max(1, tn * row_bytes)

    while TN > 1 and ts_budget(TN, TARGET_BLOCK_BYTES) < min(S, TS_MIN):
        TN = max(1, TN // 2)

    ts = ts_budget(TN, TARGET_BLOCK_BYTES)
    if ts >= S:
        TS = S                                           # full spatial extent (always legal)
    else:
        ts = max(ts, min(S, TS_MIN))                     # keep contiguous runs long enough
        ts = min(ts, ts_budget(TN, MAX_BLOCK_BYTES))     # ...but respect the VMEM cap
        TS = max(LANE, (ts // LANE) * LANE)              # multiple of 128 lanes
        if TS >= S:
            TS = S
    # TODO(synk): for very small C (< 8 f32 / < 16 bf16 sublanes) folding C into the lane
    # axis would restore full vreg occupancy; not implemented here.

    GN = pl.cdiv(N, TN)
    NS = pl.cdiv(S, TS)
    grid = (GN, NS)                                      # reduction axis (S) innermost

    kernel = functools.partial(gap_linear_kernel, S=S, TS=TS, NS=NS)
    out_dtype = x_ncdhw.dtype

    cost = pl.CostEstimate(
        flops=int(N) * C * S + 2 * int(N) * C * O_pad,
        transcendentals=0,
        bytes_accessed=int(N) * C * S * itemsize + C * O_pad * 4 + O_pad * 4
        + GN * TN * O_pad * jnp.dtype(out_dtype).itemsize,
    )

    def make_call(single_buffer_consts):
        # Weight/bias have constant index_maps -> fetched once; single-buffering them
        # reclaims VMEM (matters most inside v7x's 64 MiB per-core budget).
        const_kw = ({"pipeline_mode": pl.Buffered(1)} if single_buffer_consts else {})
        grid_spec = pltpu.PrefetchScalarGridSpec(
            num_scalar_prefetch=0,
            grid=grid,
            in_specs=[
                pl.BlockSpec((TN, C, TS), lambda n, s: (n, 0, s)),
                pl.BlockSpec((C, O_pad), lambda n, s: (0, 0), **const_kw),
                pl.BlockSpec((1, O_pad), lambda n, s: (0, 0), **const_kw),
            ],
            # 3-D output (GN, TN, O_pad): the trailing block dims always equal the full
            # array dims, so stores stay lane-dense/unmasked even when TN < 8.
            out_specs=pl.BlockSpec((1, TN, O_pad), lambda n, s: (n, 0, 0)),
            scratch_shapes=[pltpu.VMEM((TN, C, LANE), jnp.float32)],
        )
        return pl.pallas_call(
            kernel,
            out_shape=jax.ShapeDtypeStruct((GN, TN, O_pad), out_dtype),
            grid_spec=grid_spec,
            compiler_params=pltpu.CompilerParams(
                dimension_semantics=("parallel", "arbitrary"),
                vmem_limit_bytes=48 * 1024 * 1024,
            ),
            cost_estimate=cost,
        )

    try:
        out = make_call(True)(x_ncs, w_co, b_1o)
    except Exception:
        # pipeline_mode / Buffered(1) unsupported on this jax build -> default buffering.
        out = make_call(False)(x_ncs, w_co, b_1o)

    return out.reshape(GN * TN, O_pad)[:N, :O]


if __name__ == "__main__":
    # Small deterministic example consistent with the module's forward (prompt=None).
    N, C, D, H, W = 2, 4, 4, 4, 4      # in_channels = 4, spatial = 4x4x4
    O = 8                              # out_channels = 8

    key = jax.random.PRNGKey(0)
    kx, kw, kb = jax.random.split(key, 3)
    x = jax.random.normal(kx, (N, C, D, H, W), dtype=jnp.float32)
    # Deterministic synthetic params mimicking nn.Linear(in=C, out=O).
    weight = jax.random.normal(kw, (O, C), dtype=jnp.float32) * 0.1
    bias = jax.random.normal(kb, (O,), dtype=jnp.float32) * 0.1

    out = gap_linear(x, weight, bias)
    out = jax.block_until_ready(out)

    # Reference (same math as the PyTorch forward with prompt=None).
    pooled_ref = jnp.mean(x, axis=(2, 3, 4))                 # (N, C)
    ref = pooled_ref @ weight.T + bias                       # (N, O)
    assert out.shape == (N, O)
    assert jnp.allclose(out, ref, atol=1e-5, rtol=1e-5), "mismatch vs reference"

    # TODO(synk): the `prompt is not None` branch uses self.prompt_ft, which is not
    # defined in the reference module, so only the prompt=None path is implemented.

    print("KERNEL_OK")
</pallas_src>

<mosaic_0001>
module attributes {stable_mosaic.version = 11 : i64} {
  func.func @gap_linear_kernel(%arg0: i32, %arg1: i32, %arg2: memref<1x4x64xf32, #tpu.memory_space<vmem>>, %arg3: memref<4x128xf32, #tpu.memory_space<vmem>>, %arg4: memref<1x128xf32, #tpu.memory_space<vmem>>, %arg5: memref<1x1x128xf32, #tpu.memory_space<vmem>>, %arg6: memref<1x4x128xf32, #tpu.memory_space<vmem>>) attributes {dimension_semantics = [#tpu.dimension_semantics<parallel>, #tpu.dimension_semantics<arbitrary>], iteration_bounds = array<i64: 2, 1>, scalar_prefetch = 0 : i64, scratch_operands = 1 : i64, tpu.core_type = #tpu.core_type<tc>, window_params = [{transform_indices = @transform_0, window_bounds = array<i64: 1, 4, 64>}, {pipeline_mode = #tpu.pipeline_mode<synchronous>, transform_indices = @transform_1, window_bounds = array<i64: 4, 128>}, {pipeline_mode = #tpu.pipeline_mode<synchronous>, transform_indices = @transform_2, window_bounds = array<i64: 1, 128>}, {transform_indices = @transform_3, window_bounds = array<i64: 1, 1, 128>}]} {
    %c0_i32 = arith.constant 0 : i32
    %0 = arith.cmpi eq, %arg1, %c0_i32 : i32
    %1 = arith.extui %0 : i1 to i32
    %c0_i32_0 = arith.constant 0 : i32
    %2 = arith.cmpi ne, %1, %c0_i32_0 : i32
    scf.if %2 {
      %cst = arith.constant 0.000000e+00 : f32
      %10 = vector.broadcast %cst : f32 to vector<1x4x128xf32>
      %c0_11 = arith.constant 0 : index
      %c0_12 = arith.constant 0 : index
      %c0_13 = arith.constant 0 : index
      %11 = vector.load %arg6[%c0_11, %c0_12, %c0_13] : memref<1x4x128xf32, #tpu.memory_space<vmem>>, vector<1x4x128xf32>
      tpu.vector_store %arg6[%c0_11, %c0_12, %c0_13], %10 {strides = array<i32>} : memref<1x4x128xf32, #tpu.memory_space<vmem>>, vector<1x4x128xf32>,
    } else {
    }
    %c0 = arith.constant 0 : index
    %c0_1 = arith.constant 0 : index
    %c0_2 = arith.constant 0 : index
    %3 = vector.load %arg6[%c0, %c0_1, %c0_2] : memref<1x4x128xf32, #tpu.memory_space<vmem>>, vector<1x4x64xf32>
    %c0_3 = arith.constant 0 : index
    %c0_4 = arith.constant 0 : index
    %c0_5 = arith.constant 0 : index
    %4 = vector.load %arg2[%c0_3, %c0_4, %c0_5] : memref<1x4x64xf32, #tpu.memory_space<vmem>>, vector<1x4x64xf32>
    %5 = arith.addf %3, %4 : vector<1x4x64xf32>
    %c0_6 = arith.constant 0 : index
    %c0_7 = arith.constant 0 : index
    %c0_8 = arith.constant 0 : index
    %6 = vector.load %arg6[%c0_6, %c0_7, %c0_8] : memref<1x4x128xf32, #tpu.memory_space<vmem>>, vector<1x4x64xf32>
    tpu.vector_store %arg6[%c0_6, %c0_7, %c0_8], %5 {strides = array<i32>} : memref<1x4x128xf32, #tpu.memory_space<vmem>>, vector<1x4x64xf32>,
    %c0_i32_9 = arith.constant 0 : i32
    %7 = arith.cmpi eq, %arg1, %c0_i32_9 : i32
    %8 = arith.extui %7 : i1 to i32
    %c0_i32_10 = arith.constant 0 : i32
    %9 = arith.cmpi ne, %8, %c0_i32_10 : i32
    scf.if %9 {
      %c0_11 = arith.constant 0 : index
      %c0_12 = arith.constant 0 : index
      %c0_13 = arith.constant 0 : index
      %10 = vector.load %arg6[%c0_11, %c0_12, %c0_13] : memref<1x4x128xf32, #tpu.memory_space<vmem>>, vector<1x4x128xf32>
      %cst = arith.constant dense<0.000000e+00> : vector<1x4xf32>
      %11 = vector.multi_reduction <add>, %10, %cst [2] : vector<1x4x128xf32> to vector<1x4xf32>
      %c0_14 = arith.constant 0 : index
      %c0_15 = arith.constant 0 : index
      %12 = vector.load %arg3[%c0_14, %c0_15] : memref<4x128xf32, #tpu.memory_space<vmem>>, vector<4x128xf32>
      %cst_16 = arith.constant dense<0.000000e+00> : vector<1x128xf32>
      %13 = tpu.matmul %11, %12, %cst_16 {dimension_numbers = #tpu.dot_dimension_numbers<[1], [0], [0], [1], [0, 0, 1, 1], [], []>} : vector<1x4xf32>, vector<4x128xf32>, vector<1x128xf32> -> vector<1x128xf32>
      %c0_17 = arith.constant 0 : index
      %c0_18 = arith.constant 0 : index
      %14 = vector.load %arg4[%c0_17, %c0_18] : memref<1x128xf32, #tpu.memory_space<vmem>>, vector<1x128xf32>
      %15 = arith.addf %13, %14 : vector<1x128xf32>
      %16 = vector.shape_cast %15 : vector<1x128xf32> to vector<1x1x128xf32>
      %c0_19 = arith.constant 0 : index
      %c0_20 = arith.constant 0 : index
      %c0_21 = arith.constant 0 : index
      %17 = vector.load %arg5[%c0_19, %c0_20, %c0_21] : memref<1x1x128xf32, #tpu.memory_space<vmem>>, vector<1x1x128xf32>
      tpu.vector_store %arg5[%c0_19, %c0_20, %c0_21], %16 {strides = array<i32>} : memref<1x1x128xf32, #tpu.memory_space<vmem>>, vector<1x1x128xf32>,
    } else {
    }
    return
  }
  func.func @transform_0(%arg0: i32, %arg1: i32) -> (i32, i32, i32) {
    %c0_i32 = arith.constant 0 : i32
    %c0_i32_0 = arith.constant 0 : i32
    return %arg0, %c0_i32, %arg1 : i32, i32, i32
  }
  func.func @transform_1(%arg0: i32, %arg1: i32) -> (i32, i32) {
    %c0_i32 = arith.constant 0 : i32
    %c0_i32_0 = arith.constant 0 : i32
    %c0_i32_1 = arith.constant 0 : i32
    return %c0_i32, %c0_i32_0 : i32, i32
  }
  func.func @transform_2(%arg0: i32, %arg1: i32) -> (i32, i32) {
    %c0_i32 = arith.constant 0 : i32
    %c0_i32_0 = arith.constant 0 : i32
    %c0_i32_1 = arith.constant 0 : i32
    return %c0_i32, %c0_i32_0 : i32, i32
  }
  func.func @transform_3(%arg0: i32, %arg1: i32) -> (i32, i32, i32) {
    %c0_i32 = arith.constant 0 : i32
    %c0_i32_0 = arith.constant 0 : i32
    %c0_i32_1 = arith.constant 0 : i32
    return %arg0, %c0_i32, %c0_i32_0 : i32, i32, i32
  }
}

module attributes {stable_mosaic.version = 11 : i64} {
  func.func @gap_linear_kernel(%arg0: i32, %arg1: i32, %arg2: memref<1x4x64xf32, #tpu.memory_space<vmem>>, %arg3: memref<4x128xf32, #tpu.memory_space<vmem>>, %arg4: memref<1x128xf32, #tpu.memory_space<vmem>>, %arg5: memref<1x1x128xf32, #tpu.memory_space<vmem>>, %arg6: memref<1x4x128xf32, #tpu.memory_space<vmem>>) attributes {dimension_semantics = [#tpu.dimension_semantics<parallel>, #tpu.dimension_semantics<arbitrary>], iteration_bounds = array<i64: 2, 1>, scalar_prefetch = 0 : i64, scratch_operands = 1 : i64, tpu.core_type = #tpu.core_type<tc>, window_params = [{transform_indices = @transform_0, window_bounds = array<i64: 1, 4, 64>}, {pipeline_mode = #tpu.pipeline_mode<synchronous>, transform_indices = @transform_1, window_bounds = array<i64: 4, 128>}, {pipeline_mode = #tpu.pipeline_mode<synchronous>, transform_indices = @transform_2, window_bounds = array<i64: 1, 128>}, {transform_indices = @transform_3, window_bounds = array<i64: 1, 1, 128>}]} {
    %c0_i32 = arith.constant 0 : i32
    %0 = arith.cmpi eq, %arg1, %c0_i32 : i32
    %1 = arith.extui %0 : i1 to i32
    %c0_i32_0 = arith.constant 0 : i32
    %2 = arith.cmpi ne, %1, %c0_i32_0 : i32
    scf.if %2 {
      %cst = arith.constant 0.000000e+00 : f32
      %10 = vector.broadcast %cst : f32 to vector<1x4x128xf32>
      %c0_11 = arith.constant 0 : index
      %c0_12 = arith.constant 0 : index
      %c0_13 = arith.constant 0 : index
      %11 = vector.load %arg6[%c0_11, %c0_12, %c0_13] : memref<1x4x128xf32, #tpu.memory_space<vmem>>, vector<1x4x128xf32>
      tpu.vector_store %arg6[%c0_11, %c0_12, %c0_13], %10 {strides = array<i32>} : memref<1x4x128xf32, #tpu.memory_space<vmem>>, vector<1x4x128xf32>,
    } else {
    }
    %c0 = arith.constant 0 : index
    %c0_1 = arith.constant 0 : index
    %c0_2 = arith.constant 0 : index
    %3 = vector.load %arg6[%c0, %c0_1, %c0_2] : memref<1x4x128xf32, #tpu.memory_space<vmem>>, vector<1x4x64xf32>
    %c0_3 = arith.constant 0 : index
    %c0_4 = arith.constant 0 : index
    %c0_5 = arith.constant 0 : index
    %4 = vector.load %arg2[%c0_3, %c0_4, %c0_5] : memref<1x4x64xf32, #tpu.memory_space<vmem>>, vector<1x4x64xf32>
    %5 = arith.addf %3, %4 : vector<1x4x64xf32>
    %c0_6 = arith.constant 0 : index
    %c0_7 = arith.constant 0 : index
    %c0_8 = arith.constant 0 : index
    %6 = vector.load %arg6[%c0_6, %c0_7, %c0_8] : memref<1x4x128xf32, #tpu.memory_space<vmem>>, vector<1x4x64xf32>
    tpu.vector_store %arg6[%c0_6, %c0_7, %c0_8], %5 {strides = array<i32>} : memref<1x4x128xf32, #tpu.memory_space<vmem>>, vector<1x4x64xf32>,
    %c0_i32_9 = arith.constant 0 : i32
    %7 = arith.cmpi eq, %arg1, %c0_i32_9 : i32
    %8 = arith.extui %7 : i1 to i32
    %c0_i32_10 = arith.constant 0 : i32
    %9 = arith.cmpi ne, %8, %c0_i32_10 : i32
    scf.if %9 {
      %c0_11 = arith.constant 0 : index
      %c0_12 = arith.constant 0 : index
      %c0_13 = arith.constant 0 : index
      %10 = vector.load %arg6[%c0_11, %c0_12, %c0_13] : memref<1x4x128xf32, #tpu.memory_space<vmem>>, vector<1x4x128xf32>
      %cst = arith.constant dense<0.000000e+00> : vector<1x4xf32>
      %11 = vector.multi_reduction <add>, %10, %cst [2] : vector<1x4x128xf32> to vector<1x4xf32>
      %c0_14 = arith.constant 0 : index
      %c0_15 = arith.constant 0 : index
      %12 = vector.load %arg3[%c0_14, %c0_15] : memref<4x128xf32, #tpu.memory_space<vmem>>, vector<4x128xf32>
      %cst_16 = arith.constant dense<0.000000e+00> : vector<1x128xf32>
      %13 = tpu.matmul %11, %12, %cst_16 {dimension_numbers = #tpu.dot_dimension_numbers<[1], [0], [0], [1], [0, 0, 1, 1], [], []>} : vector<1x4xf32>, vector<4x128xf32>, vector<1x128xf32> -> vector<1x128xf32>
      %c0_17 = arith.constant 0 : index
      %c0_18 = arith.constant 0 : index
      %14 = vector.load %arg4[%c0_17, %c0_18] : memref<1x128xf32, #tpu.memory_space<vmem>>, vector<1x128xf32>
      %15 = arith.addf %13, %14 : vector<1x128xf32>
      %16 = vector.shape_cast %15 : vector<1x128xf32> to vector<1x1x128xf32>
      %c0_19 = arith.constant 0 : index
      %c0_20 = arith.constant 0 : index
      %c0_21 = arith.constant 0 : index
      %17 = vector.load %arg5[%c0_19, %c0_20, %c0_21] : memref<1x1x128xf32, #tpu.memory_space<vmem>>, vector<1x1x128xf32>
      tpu.vector_store %arg5[%c0_19, %c0_20, %c0_21], %16 {strides = array<i32>} : memref<1x1x128xf32, #tpu.memory_space<vmem>>, vector<1x1x128xf32>,
    } else {
    }
    return
  }
  func.func @transform_0(%arg0: i32, %arg1: i32) -> (i32, i32, i32) {
    %c0_i32 = arith.constant 0 : i32
    %c0_i32_0 = arith.constant 0 : i32
    return %arg0, %c0_i32, %arg1 : i32, i32, i32
  }
  func.func @transform_1(%arg0: i32, %arg1: i32) -> (i32, i32) {
    %c0_i32 = arith.constant 0 : i32
    %c0_i32_0 = arith.constant 0 : i32
    %c0_i32_1 = arith.constant 0 : i32
    return %c0_i32, %c0_i32_0 : i32, i32
  }
  func.func @transform_2(%arg0: i32, %arg1: i32) -> (i32, i32) {
    %c0_i32 = arith.constant 0 : i32
    %c0_i32_0 = arith.constant 0 : i32
    %c0_i32_1 = arith.constant 0 : i32
    return %c0_i32, %c0_i32_0 : i32, i32
  }
  func.func @transform_3(%arg0: i32, %arg1: i32) -> (i32, i32, i32) {
    %c0_i32 = arith.constant 0 : i32
    %c0_i32_0 = arith.constant 0 : i32
    %c0_i32_1 = arith.constant 0 : i32
    return %arg0, %c0_i32, %c0_i32_0 : i32, i32, i32
  }
}

</mosaic_0001>

<bundles_post_ra>
// kernel: tpu_custom_call.1
= control target key start
LH: loop header
LB: loop body
LE: loop exit
PB: predicated region body
PF: predicated region fallthrough
CT: control target
= control target key end

     0   :  { %8 = vsyncpa [#allocation4], 0  ;;  %s903_s0 = inlined_call_operand.hbm [shape: f32[2,4,64], index: 0, kind: input, shape index: {}]   ;;  %s904_s1 = inlined_call_operand.hbm [shape: f32[4,128], index: 1, kind: input, shape index: {}]   ;;  %s905_s2 = inlined_call_operand.vmem [shape: f32[1,128], index: 2, kind: input, shape index: {}]   ;;  %s906_s3 = inlined_call_operand.hbm [shape: f32[2,1,128], index: 3, kind: output, shape index: {}]  }
   0x1   :  { %10 = vsyncpa [#allocation4 + $0x1], 0 }
   0x2   :  { %11 = vsyncpa [#allocation7], 0 }
   0x3   :  { %12 = vsyncpa [#allocation5], 0 }
   0x4   :  { %14 = vsyncpa [#allocation5 + $0x1], 0  ;;  %s683_s12 = smov 0   ;;  %s685_s13 = smov 0  }
   0x5   :  { %s687_s14 = smov 0   ;;  %s689_s15 = smov 0  }
   0x6   :  { %s691_s16 = smov 0   ;;  %s693_s17 = smov 0  }
   0x7 LB: > { %s415_s18 = sadd.s32 4294967295, %s656_s17   ;;  %s416_s19 = sadd.s32 4294967294, %s656_s17   ;;  %s656_s17 = sphi %s693_s17, %s20_s17   ;;  %s652_s16 = sphi %s691_s16, %s931_s16   ;;  %s648_s15 = sphi %s689_s15, %s930_s15   ;;  %s644_s14 = sphi %s687_s14, %s929_s14   ;;  %s640_s13 = sphi %s685_s13, %s928_s13   ;;  %s636_s12 = sphi %s683_s12, %s927_s12  }
   0x8   : > { %p54_p0 = scmp.ne.s32.totalorder %s640_s13, %s636_s12  ;;  %p717_p1 = scmp.eq.s32.totalorder %s415_s18, 0 }
   0x9   : > { %p721_p2 = scmp.eq.s32.totalorder %s415_s18, 1  ;;  %p126_p3 = scmp.eq.s32.totalorder %s416_s19, 1 }
   0xa   : > { %s911_s20 = scalar_select %p717_p1, 1, 0 }
   0xb   : > { %s912_s21 = scalar_select %p721_p2, 1, 0 }
   0xc   : > { %p727_p4 = por %p717_p1, %p54_p0  ;;  %p417_p5 = scmp.ge.s32.totalorder %s656_s17, 1 }
   0xd   : > { %p732_p6 = por %p126_p3, %p54_p0  ;;  %p133_p7 = scmp.lt.s32.totalorder %s656_s17, 3 }
   0xe   : > { %s913_s22 = scalar_select %p727_p4, 1, 0 }
   0xf   : > { %s914_s23 = scalar_select %p732_p6, 1, 0 }
  0x10   : > { %p737_p8 = pnand %p417_p5, %p133_p7  ;;  %s658_s25 = smov [#allocation6]  }
  0x11   : > { %s146_s26 = sshll.u32 %s658_s25, 4  ;;  %s32_s28 = sadd.s32 1, %s652_s16  ;;  %s147_s26 = int_to_ptr.vmem [resolvable:$true] %s146_s26 }
  0x12   : > { %s915_s24 = scalar_select %p737_p8, 1, 0 }
  0x13   : > { %p445_p10 = pneg %p737_p8  ;;  %s41_s29 = sadd.s32 1, %s644_s14 }
  0x14   : > { %p752_p12 = scmp.ge.s32.totalorder %s32_s28, 2  ;;  %s512_s6 = scalar_lea.hbm %s904_s1, 64 }
  0x15   : > { %p746_p11 = pnand %p445_p10, %p717_p1  ;;  %p513_p13 = scmp.ne.s32.totalorder %s904_s1, %s512_s6 }
  0x16   : > { %s917_s30 = scalar_select %p752_p12, 1, 0 }
  0x17   : > { %p514_p0 = pneg %p746_p11  ;;  %p519_p7 = scmp.lt.u32.totalorder %s512_s6, %s904_s1 }
  0x19   : > { %p515_p3 = pnand %p514_p0, %p513_p13 }
  0x1b   : > { %p516_p5 = pneg %p515_p3 }
  0x1d   : > { %p521_p10 = pnand %p519_p7, %p516_p5 }
  0x1f   : > { %524 = shalt.err (!%p521_p10)
}
  0x20   : > { %s525_s11 = scalar_lea.vmem %s147_s26, 64  ;;  %p533_p4 = scmp.lt.s32.totalorder %s147_s26, %s147_s26 }
  0x21   : > { %p526_p9 = scmp.ne.s32.totalorder %s147_s26, %s525_s11  ;;  %p534_p8 = scmp.lt.s32.totalorder %s525_s11, %s525_s11 }
  0x23   : > { %p528_p6 = pnand %p526_p9, %p514_p0  ;;  %p535_p2 = por %p534_p8, %p533_p4 }
  0x25   : > { %p529_p1 = pneg %p528_p6 }
  0x27   : > { %p536_p12 = pnand %p535_p2, %p529_p1 }
  0x29   : > { %539 = shalt.err (!%p536_p12)
}
  0x2a   : > { %448 = dma.hbm_to_vmem [thread:$0]  (!%p746_p11), %s904_s1, 64, %s147_s26, [#allocation7]  }
  0x2b   : > { %p918_p4 = scmp.ne.s32.totalorder %s917_s30, 0  ;;  %p48_p1 = scmp.ne.s32.totalorder %s644_s14, %s640_s13 }
  0x2c   : > { %p49_p2 = scmp.eq.s32.totalorder %s656_s17, 0  ;;  %p458_p6 = scmp.lt.s32.totalorder %s656_s17, 2 }
  0x2d   : > { %s933_s28 = smov (%p918_p4, %s32_s28), 0  ;;  %p919_p12 = scmp.ne.s32.totalorder %s912_s21, 0 }
  0x2e   : > { %s36_s25 = ssub.s32 %s652_s16, %s933_s28  ;;  %p50_p9 = por %p49_p2, %p48_p1 }
  0x2f   : > { %p39_p8 = scmp.eq.s32.totalorder %s36_s25, 0  ;;  %p784_p13 = por %p919_p12, %p48_p1 }
  0x30   : > { %s160_s4 = sand.u32 1, %s644_s14   ;;  %s421_s30 = sshll.u32 %s652_s16, 6 }
  0x31   : > { %s792_s5 = scalar_select %p39_p8, %s644_s14, %s41_s29  }
  0x32   : > { %s420_s26 = sshll.u32 %s160_s4, 2  ;;  %s798_s8 = scalar_lea.hbm %s903_s0, %s421_s30 }
  0x33   : > { %s164_s21 = scalar_lea.vmem [#allocation3], %s420_s26  ;;  %p802_p11 = pnand %p458_p6, %p50_p9 }
  0x34   : > { %s172_s9 = sshll.u32 %s164_s21, 4  ;;  %s161_s29 = scalar_lea.sflag [#allocation4], %s160_s4  ;;  %s800_s9 = int_to_ptr.vmem [resolvable:$true] %s172_s9 }
  0x35   : > { %s540_s11 = scalar_lea.hbm %s798_s8, 64  ;;  %p542_p3 = pneg %p802_p11 }
  0x36   : > { %p541_p0 = scmp.ne.s32.totalorder %s798_s8, %s540_s11  ;;  %s545_s25 = scalar_lea.hbm %s903_s0, 128 }
  0x37   : > { %p546_p10 = scmp.lt.u32.totalorder %s798_s8, %s903_s0  ;;  %p547_p4 = scmp.lt.u32.totalorder %s545_s25, %s540_s11 }
  0x38   : > { %p543_p5 = pnand %p542_p3, %p541_p0  ;;  %p549_p2 = scmp.lt.u32.totalorder %s540_s11, %s798_s8 }
  0x39   : > { %p548_p1 = por %p547_p4, %p546_p10 }
  0x3a   : > { %p544_p7 = pneg %p543_p5 }
  0x3b   : > { %p550_p6 = por %p549_p2, %p548_p1 }
  0x3d   : > { %p551_p8 = pnand %p550_p6, %p544_p7 }
  0x3f   : > { %554 = shalt.err (!%p551_p8)
}
  0x40   : > { %s555_s4 = scalar_lea.vmem %s800_s9, 64  ;;  %s659_s6 = smov [#allocation3]  }
  0x41   : > { %p556_p9 = scmp.ne.s32.totalorder %s800_s9, %s555_s4  ;;  %s560_s7 = sshll.u32 %s659_s6, 4  ;;  %s561_s7 = int_to_ptr.vmem [resolvable:$false] %s560_s7 }
  0x42   : > { %s562_s21 = scalar_lea.vmem %s561_s7, 128  ;;  %p563_p5 = scmp.lt.s32.totalorder %s800_s9, %s561_s7 }
  0x43   : > { %p558_p12 = pnand %p556_p9, %p542_p3  ;;  %p564_p10 = scmp.lt.s32.totalorder %s562_s21, %s555_s4 }
  0x45   : > { %p559_p0 = pneg %p558_p12  ;;  %p565_p4 = por %p564_p10, %p563_p5 }
  0x47   : > { %p566_p1 = pnand %p565_p4, %p559_p0 }
  0x49   : > { %569 = shalt.err (!%p566_p1)
}
  0x4a   : > { %452 = dma.hbm_to_vmem [thread:$0]  (!%p802_p11), %s798_s8, 64, %s800_s9, %s161_s29  }
  0x4b   : > { %p922_p7 = scmp.ne.s32.totalorder %s915_s24, 0 }
  0x4c   : > { %s834_s11 = sand.u32 (!%p922_p7), 1, %s640_s13   ;;  %p923_p3 = scmp.ne.s32.totalorder (!%p922_p7), %s913_s22, 0 }
  0x4d   : > { %181 = sbr.rel (%p922_p7) target bundleno = 480 (0x1e0), region = 32  ;;  %s423_s18 = sshll.u32 (!%p922_p7), %s834_s11, 2 }
  0x4e   : > { %s184_s19 = scalar_lea.sflag (!%p922_p7), [#allocation4], %s834_s11  ;;  %s187_s25 = scalar_lea.vmem (!%p922_p7), [#allocation3], %s423_s18 }
  0x54   : > { %623 = dma.done.wait (%p923_p3), %s184_s19, 64  }
  0x55   : > { %625 = vsyncadd (%p923_p3), %s184_s19, 4294967232  ;;  %p924_p2 = scmp.ne.s32.totalorder %s911_s20, 0 }
  0x57   : > { %627 = dma.done.wait (%p924_p2), [#allocation7], 64  }
  0x58   : > { %629 = vsyncadd (%p924_p2), [#allocation7], 4294967232  ;;  %v660_v0 = vmov 0.0   ;;  %v219_v1 = vld [vmem:[%s187_s25] sm:$0xf]  ;;  %vm221_vm0 = vcmask 519168   ;;  %v234_v7 = vlaneseq }
  0x59   : > { %217 = vst [vmem:[#allocation2] sm:$0xf] %v660_v0  ;;  %432 = vmatprep.subr.mxu0 %v660_v0  ;;  %vm227_vm1 = vcmask 1043456   ;;  %v231_v6 = vld [vmem:[#allocation6] sm:$0xf]  ;;  %vm661_vm2 = vmmov 0  }
  0x5a   : > { %433 = vmatpush3.msk.msra.mxu0 %vm227_vm1, %v231_v6  ;;  %434 = vmatprep.mubr.msk.f32.mxu0 %vm661_vm2, %v660_v0  ;;  %v235_v8 = vand.u32 127, %v234_v7  ;;  %v237_v9 = vshrl.u32 %v234_v7, 7  ;;  %vm240_vm3 = vcmask 31744   ;;  %v232_v13 = vld [vmem:[%s905_s2] sm:$0x1]  ;;  %s427_s24 = sshll.u32 %s648_s15, 4 }
  0x5b   : > { %s212_s8 = scalar_lea.vmem [#allocation8], %s834_s11  ;;  %s854_s26 = scalar_lea.hbm %s906_s3, %s427_s24 }
  0x5c   : > { %v238_v10 = vsub.s32 %v235_v8, %v237_v9  ;;  %s330_s9 = sshll.u32 %s212_s8, 4  ;;  %s318_s30 = scalar_lea.sflag [#allocation5], %s834_s11  ;;  %s856_s9 = int_to_ptr.vmem [resolvable:$true] %s330_s9 }
  0x5d   : > { %s570_s4 = scalar_lea.vmem %s856_s9, 16  ;;  %s662_s15 = smov [#allocation8]  }
  0x5e   : > { %p571_p11 = scmp.ne.s32.totalorder %s856_s9, %s570_s4  ;;  %s574_s6 = sshll.u32 %s662_s15, 4  ;;  %s575_s6 = int_to_ptr.vmem [resolvable:$false] %s574_s6 }
  0x5f   : > { %s576_s7 = scalar_lea.vmem %s575_s6, 32  ;;  %p577_p9 = scmp.lt.s32.totalorder %s856_s9, %s575_s6 }
  0x60   : > { %v218_v2 = vld [vmem:[#allocation2] sm:$0xf]  ;;  %p572_p6 = pnand %p571_p11, %p784_p13  ;;  %p578_p12 = scmp.lt.s32.totalorder %s576_s7, %s570_s4 }
  0x61   : > { %v220_v3 = vadd.f32 %v219_v1, %v218_v2 }
  0x62   : > { %p573_p8 = pneg %p572_p6  ;;  %p579_p0 = por %p578_p12, %p577_p9 }
  0x63   : > { %222 = vst.msk [vmem:[#allocation2] sm:$0xf] %vm221_vm0, %v220_v3 }
  0x64   : > { %p580_p5 = pnand %p579_p0, %p573_p8 }
  0x6a   : > { %v226_v4 = vld [vmem:[#allocation2] sm:$0xf] }
  0x6b   : > { %v228_v5 = vsel %vm227_vm1, %v226_v4, 0.0 }
  0x6c   : > { %229 = vadd.xlane.f32.xlu0 %v228_v5 }
  0xf9   : > { %v230_v11 = vpop.xlane.xlu0 %229 }
  0xfa   : > { %v239_v12 = vrot.slane %v230_v11, %v238_v10 }
  0xfc   : > { %435 = vmatmul.mubr.msk.f32.vlgmr.msra.gmra.mrb[0].mxu0 %vm240_vm3, %v239_v12 }
 0x1cf   : > { %v312_v14 = vpop.f32.mrb[0].mxu0 }
 0x1d0   : > { %v313_v15 = vadd.f32 %v312_v14, %v232_v13  ;;  %v436_v16 = vpop.f32.mrb[1].mxu0 }
 0x1d2   : > { %316 = vst [vmem:[%s212_s8] sm:$0x1] %v313_v15 }
 0x1d3   : > { %583 = shalt.err (!%p580_p5)
}
 0x1d4   : > { %s584_s21 = scalar_lea.hbm %s854_s26, 16  ;;  %s588_s19 = scalar_lea.hbm %s906_s3, 32 }
 0x1d5   : > { %p585_p10 = scmp.ne.s32.totalorder %s854_s26, %s584_s21  ;;  %p589_p7 = scmp.lt.u32.totalorder %s854_s26, %s906_s3 }
 0x1d6   : > { %p590_p3 = scmp.lt.u32.totalorder %s588_s19, %s584_s21  ;;  %p592_p11 = scmp.lt.u32.totalorder %s584_s21, %s854_s26 }
 0x1d7   : > { %p586_p4 = pnand %p585_p10, %p784_p13 }
 0x1d8   : > { %p591_p2 = por %p590_p3, %p589_p7 }
 0x1d9   : > { %p587_p1 = pneg %p586_p4 }
 0x1da   : > { %p593_p6 = por %p592_p11, %p591_p2 }
 0x1dc   : > { %p594_p8 = pnand %p593_p6, %p587_p1 }
 0x1de   : > { %597 = shalt.err (!%p594_p8)
}
 0x1df   : > { %443 = dma.vmem_to_hbm [thread:$0]  (%p784_p13), %s856_s9, 16, %s854_s26, %s318_s30  }
 0x1e0 PF: > { %s342_s22 = sand.u32 1, %s636_s12   ;;  %p925_p9 = scmp.ne.s32.totalorder %s914_s23, 0 }
 0x1e1   : > { %p926_p12 = scmp.ge.s32.totalorder %s656_s17, 2  ;;  %s343_s24 = scalar_lea.sflag [#allocation5], %s342_s22 }
 0x1e3   : > { %p454_p0 = pnand %p926_p12, %p925_p9 }
 0x1e5   : > { %631 = dma.done.wait (!%p454_p0), %s343_s24, 16  }
 0x1e6   : > { %633 = vsyncadd (!%p454_p0), %s343_s24, 4294967280  ;;  %s20_s17 = sadd.s32 1, %s656_s17   ;;  %s927_s12 = smov %s640_s13 }
 0x1e7   : > { %p17_p5 = scmp.ge.s32.totalorder %s20_s17, 4   ;;  %s928_s13 = smov %s644_s14 }
 0x1e8   : > { %s929_s14 = smov %s792_s5  ;;  %s930_s15 = smov %s652_s16 }
 0x1e9   : > { %s931_s16 = smov %s933_s28  ;;  %19 = sbr.rel (!%p17_p5) target bundleno = 7 (0x7), region = 89 }
 0x1f0   :  { %347 = vsyncpa [#allocation4], 1 }
 0x1f1   :  { %349 = vsyncpa [#allocation4 + $0x1], 1 }
 0x1f2   :  { %350 = vsyncpa [#allocation7], 1 }
 0x1f3   :  { %351 = vsyncpa [#allocation5], 1 }
 0x1f4   :  { %353 = vsyncpa [#allocation5 + $0x1], 1 }

// kernel: tpu_custom_call.1
= control target key start
LH: loop header
LB: loop body
LE: loop exit
PB: predicated region body
PF: predicated region fallthrough
CT: control target
= control target key end

     0   :  { %8 = vsyncpa [#allocation4], 0  ;;  %s903_s0 = inlined_call_operand.hbm [shape: f32[2,4,64], index: 0, kind: input, shape index: {}]   ;;  %s904_s1 = inlined_call_operand.hbm [shape: f32[4,128], index: 1, kind: input, shape index: {}]   ;;  %s905_s2 = inlined_call_operand.vmem [shape: f32[1,128], index: 2, kind: input, shape index: {}]   ;;  %s906_s3 = inlined_call_operand.hbm [shape: f32[2,1,128], index: 3, kind: output, shape index: {}]  }
   0x1   :  { %10 = vsyncpa [#allocation4 + $0x1], 0 }
   0x2   :  { %11 = vsyncpa [#allocation7], 0 }
   0x3   :  { %12 = vsyncpa [#allocation5], 0 }
   0x4   :  { %14 = vsyncpa [#allocation5 + $0x1], 0  ;;  %s683_s12 = smov 0   ;;  %s685_s13 = smov 0  }
   0x5   :  { %s687_s14 = smov 0   ;;  %s689_s15 = smov 0  }
   0x6   :  { %s691_s16 = smov 0   ;;  %s693_s17 = smov 0  }
   0x7 LB: > { %s415_s18 = sadd.s32 4294967295, %s656_s17   ;;  %s416_s19 = sadd.s32 4294967294, %s656_s17   ;;  %s656_s17 = sphi %s693_s17, %s20_s17   ;;  %s652_s16 = sphi %s691_s16, %s931_s16   ;;  %s648_s15 = sphi %s689_s15, %s930_s15   ;;  %s644_s14 = sphi %s687_s14, %s929_s14   ;;  %s640_s13 = sphi %s685_s13, %s928_s13   ;;  %s636_s12 = sphi %s683_s12, %s927_s12  }
   0x8   : > { %p54_p0 = scmp.ne.s32.totalorder %s640_s13, %s636_s12  ;;  %p717_p1 = scmp.eq.s32.totalorder %s415_s18, 0 }
   0x9   : > { %p721_p2 = scmp.eq.s32.totalorder %s415_s18, 1  ;;  %p126_p3 = scmp.eq.s32.totalorder %s416_s19, 1 }
   0xa   : > { %s911_s20 = scalar_select %p717_p1, 1, 0 }
   0xb   : > { %s912_s21 = scalar_select %p721_p2, 1, 0 }
   0xc   : > { %p727_p4 = por %p717_p1, %p54_p0  ;;  %p417_p5 = scmp.ge.s32.totalorder %s656_s17, 1 }
   0xd   : > { %p732_p6 = por %p126_p3, %p54_p0  ;;  %p133_p7 = scmp.lt.s32.totalorder %s656_s17, 3 }
   0xe   : > { %s913_s22 = scalar_select %p727_p4, 1, 0 }
   0xf   : > { %s914_s23 = scalar_select %p732_p6, 1, 0 }
  0x10   : > { %p737_p8 = pnand %p417_p5, %p133_p7  ;;  %s658_s25 = smov [#allocation6]  }
  0x11   : > { %s146_s26 = sshll.u32 %s658_s25, 4  ;;  %s32_s28 = sadd.s32 1, %s652_s16  ;;  %s147_s26 = int_to_ptr.vmem [resolvable:$true] %s146_s26 }
  0x12   : > { %s915_s24 = scalar_select %p737_p8, 1, 0 }
  0x13   : > { %p445_p10 = pneg %p737_p8  ;;  %s41_s29 = sadd.s32 1, %s644_s14 }
  0x14   : > { %p752_p12 = scmp.ge.s32.totalorder %s32_s28, 2  ;;  %s512_s6 = scalar_lea.hbm %s904_s1, 64 }
  0x15   : > { %p746_p11 = pnand %p445_p10, %p717_p1  ;;  %p513_p13 = scmp.ne.s32.totalorder %s904_s1, %s512_s6 }
  0x16   : > { %s917_s30 = scalar_select %p752_p12, 1, 0 }
  0x17   : > { %p514_p0 = pneg %p746_p11  ;;  %p519_p7 = scmp.lt.u32.totalorder %s512_s6, %s904_s1 }
  0x19   : > { %p515_p3 = pnand %p514_p0, %p513_p13 }
  0x1b   : > { %p516_p5 = pneg %p515_p3 }
  0x1d   : > { %p521_p10 = pnand %p519_p7, %p516_p5 }
  0x1f   : > { %524 = shalt.err (!%p521_p10)
}
  0x20   : > { %s525_s11 = scalar_lea.vmem %s147_s26, 64  ;;  %p533_p4 = scmp.lt.s32.totalorder %s147_s26, %s147_s26 }
  0x21   : > { %p526_p9 = scmp.ne.s32.totalorder %s147_s26, %s525_s11  ;;  %p534_p8 = scmp.lt.s32.totalorder %s525_s11, %s525_s11 }
  0x23   : > { %p528_p6 = pnand %p526_p9, %p514_p0  ;;  %p535_p2 = por %p534_p8, %p533_p4 }
  0x25   : > { %p529_p1 = pneg %p528_p6 }
  0x27   : > { %p536_p12 = pnand %p535_p2, %p529_p1 }
  0x29   : > { %539 = shalt.err (!%p536_p12)
}
  0x2a   : > { %448 = dma.hbm_to_vmem [thread:$0]  (!%p746_p11), %s904_s1, 64, %s147_s26, [#allocation7]  }
  0x2b   : > { %p918_p4 = scmp.ne.s32.totalorder %s917_s30, 0  ;;  %p48_p1 = scmp.ne.s32.totalorder %s644_s14, %s640_s13 }
  0x2c   : > { %p49_p2 = scmp.eq.s32.totalorder %s656_s17, 0  ;;  %p458_p6 = scmp.lt.s32.totalorder %s656_s17, 2 }
  0x2d   : > { %s933_s28 = smov (%p918_p4, %s32_s28), 0  ;;  %p919_p12 = scmp.ne.s32.totalorder %s912_s21, 0 }
  0x2e   : > { %s36_s25 = ssub.s32 %s652_s16, %s933_s28  ;;  %p50_p9 = por %p49_p2, %p48_p1 }
  0x2f   : > { %p39_p8 = scmp.eq.s32.totalorder %s36_s25, 0  ;;  %p784_p13 = por %p919_p12, %p48_p1 }
  0x30   : > { %s160_s4 = sand.u32 1, %s644_s14   ;;  %s421_s30 = sshll.u32 %s652_s16, 6 }
  0x31   : > { %s792_s5 = scalar_select %p39_p8, %s644_s14, %s41_s29  }
  0x32   : > { %s420_s26 = sshll.u32 %s160_s4, 2  ;;  %s798_s8 = scalar_lea.hbm %s903_s0, %s421_s30 }
  0x33   : > { %s164_s21 = scalar_lea.vmem [#allocation3], %s420_s26  ;;  %p802_p11 = pnand %p458_p6, %p50_p9 }
  0x34   : > { %s172_s9 = sshll.u32 %s164_s21, 4  ;;  %s161_s29 = scalar_lea.sflag [#allocation4], %s160_s4  ;;  %s800_s9 = int_to_ptr.vmem [resolvable:$true] %s172_s9 }
  0x35   : > { %s540_s11 = scalar_lea.hbm %s798_s8, 64  ;;  %p542_p3 = pneg %p802_p11 }
  0x36   : > { %p541_p0 = scmp.ne.s32.totalorder %s798_s8, %s540_s11  ;;  %s545_s25 = scalar_lea.hbm %s903_s0, 128 }
  0x37   : > { %p546_p10 = scmp.lt.u32.totalorder %s798_s8, %s903_s0  ;;  %p547_p4 = scmp.lt.u32.totalorder %s545_s25, %s540_s11 }
  0x38   : > { %p543_p5 = pnand %p542_p3, %p541_p0  ;;  %p549_p2 = scmp.lt.u32.totalorder %s540_s11, %s798_s8 }
  0x39   : > { %p548_p1 = por %p547_p4, %p546_p10 }
  0x3a   : > { %p544_p7 = pneg %p543_p5 }
  0x3b   : > { %p550_p6 = por %p549_p2, %p548_p1 }
  0x3d   : > { %p551_p8 = pnand %p550_p6, %p544_p7 }
  0x3f   : > { %554 = shalt.err (!%p551_p8)
}
  0x40   : > { %s555_s4 = scalar_lea.vmem %s800_s9, 64  ;;  %s659_s6 = smov [#allocation3]  }
  0x41   : > { %p556_p9 = scmp.ne.s32.totalorder %s800_s9, %s555_s4  ;;  %s560_s7 = sshll.u32 %s659_s6, 4  ;;  %s561_s7 = int_to_ptr.vmem [resolvable:$false] %s560_s7 }
  0x42   : > { %s562_s21 = scalar_lea.vmem %s561_s7, 128  ;;  %p563_p5 = scmp.lt.s32.totalorder %s800_s9, %s561_s7 }
  0x43   : > { %p558_p12 = pnand %p556_p9, %p542_p3  ;;  %p564_p10 = scmp.lt.s32.totalorder %s562_s21, %s555_s4 }
  0x45   : > { %p559_p0 = pneg %p558_p12  ;;  %p565_p4 = por %p564_p10, %p563_p5 }
  0x47   : > { %p566_p1 = pnand %p565_p4, %p559_p0 }
  0x49   : > { %569 = shalt.err (!%p566_p1)
}
  0x4a   : > { %452 = dma.hbm_to_vmem [thread:$0]  (!%p802_p11), %s798_s8, 64, %s800_s9, %s161_s29  }
  0x4b   : > { %p922_p7 = scmp.ne.s32.totalorder %s915_s24, 0 }
  0x4c   : > { %s834_s11 = sand.u32 (!%p922_p7), 1, %s640_s13   ;;  %p923_p3 = scmp.ne.s32.totalorder (!%p922_p7), %s913_s22, 0 }
  0x4d   : > { %181 = sbr.rel (%p922_p7) target bundleno = 480 (0x1e0), region = 32  ;;  %s423_s18 = sshll.u32 (!%p922_p7), %s834_s11, 2 }
  0x4e   : > { %s184_s19 = scalar_lea.sflag (!%p922_p7), [#allocation4], %s834_s11  ;;  %s187_s25 = scalar_lea.vmem (!%p922_p7), [#allocation3], %s423_s18 }
  0x54   : > { %623 = dma.done.wait (%p923_p3), %s184_s19, 64  }
  0x55   : > { %625 = vsyncadd (%p923_p3), %s184_s19, 4294967232  ;;  %p924_p2 = scmp.ne.s32.totalorder %s911_s20, 0 }
  0x57   : > { %627 = dma.done.wait (%p924_p2), [#allocation7], 64  }
  0x58   : > { %629 = vsyncadd (%p924_p2), [#allocation7], 4294967232  ;;  %v660_v0 = vmov 0.0   ;;  %v219_v1 = vld [vmem:[%s187_s25] sm:$0xf]  ;;  %vm221_vm0 = vcmask 519168   ;;  %v234_v7 = vlaneseq }
  0x59   : > { %217 = vst [vmem:[#allocation2] sm:$0xf] %v660_v0  ;;  %432 = vmatprep.subr.mxu0 %v660_v0  ;;  %vm227_vm1 = vcmask 1043456   ;;  %v231_v6 = vld [vmem:[#allocation6] sm:$0xf]  ;;  %vm661_vm2 = vmmov 0  }
  0x5a   : > { %433 = vmatpush3.msk.msra.mxu0 %vm227_vm1, %v231_v6  ;;  %434 = vmatprep.mubr.msk.f32.mxu0 %vm661_vm2, %v660_v0  ;;  %v235_v8 = vand.u32 127, %v234_v7  ;;  %v237_v9 = vshrl.u32 %v234_v7, 7  ;;  %vm240_vm3 = vcmask 31744   ;;  %v232_v13 = vld [vmem:[%s905_s2] sm:$0x1]  ;;  %s427_s24 = sshll.u32 %s648_s15, 4 }
  0x5b   : > { %s212_s8 = scalar_lea.vmem [#allocation8], %s834_s11  ;;  %s854_s26 = scalar_lea.hbm %s906_s3, %s427_s24 }
  0x5c   : > { %v238_v10 = vsub.s32 %v235_v8, %v237_v9  ;;  %s330_s9 = sshll.u32 %s212_s8, 4  ;;  %s318_s30 = scalar_lea.sflag [#allocation5], %s834_s11  ;;  %s856_s9 = int_to_ptr.vmem [resolvable:$true] %s330_s9 }
  0x5d   : > { %s570_s4 = scalar_lea.vmem %s856_s9, 16  ;;  %s662_s15 = smov [#allocation8]  }
  0x5e   : > { %p571_p11 = scmp.ne.s32.totalorder %s856_s9, %s570_s4  ;;  %s574_s6 = sshll.u32 %s662_s15, 4  ;;  %s575_s6 = int_to_ptr.vmem [resolvable:$false] %s574_s6 }
  0x5f   : > { %s576_s7 = scalar_lea.vmem %s575_s6, 32  ;;  %p577_p9 = scmp.lt.s32.totalorder %s856_s9, %s575_s6 }
  0x60   : > { %v218_v2 = vld [vmem:[#allocation2] sm:$0xf]  ;;  %p572_p6 = pnand %p571_p11, %p784_p13  ;;  %p578_p12 = scmp.lt.s32.totalorder %s576_s7, %s570_s4 }
  0x61   : > { %v220_v3 = vadd.f32 %v219_v1, %v218_v2 }
  0x62   : > { %p573_p8 = pneg %p572_p6  ;;  %p579_p0 = por %p578_p12, %p577_p9 }
  0x63   : > { %222 = vst.msk [vmem:[#allocation2] sm:$0xf] %vm221_vm0, %v220_v3 }
  0x64   : > { %p580_p5 = pnand %p579_p0, %p573_p8 }
  0x6a   : > { %v226_v4 = vld [vmem:[#allocation2] sm:$0xf] }
  0x6b   : > { %v228_v5 = vsel %vm227_vm1, %v226_v4, 0.0 }
  0x6c   : > { %229 = vadd.xlane.f32.xlu0 %v228_v5 }
  0xf9   : > { %v230_v11 = vpop.xlane.xlu0 %229 }
  0xfa   : > { %v239_v12 = vrot.slane %v230_v11, %v238_v10 }
  0xfc   : > { %435 = vmatmul.mubr.msk.f32.vlgmr.msra.gmra.mrb[0].mxu0 %vm240_vm3, %v239_v12 }
 0x1cf   : > { %v312_v14 = vpop.f32.mrb[0].mxu0 }
 0x1d0   : > { %v313_v15 = vadd.f32 %v312_v14, %v232_v13  ;;  %v436_v16 = vpop.f32.mrb[1].mxu0 }
 0x1d2   : > { %316 = vst [vmem:[%s212_s8] sm:$0x1] %v313_v15 }
 0x1d3   : > { %583 = shalt.err (!%p580_p5)
}
 0x1d4   : > { %s584_s21 = scalar_lea.hbm %s854_s26, 16  ;;  %s588_s19 = scalar_lea.hbm %s906_s3, 32 }
 0x1d5   : > { %p585_p10 = scmp.ne.s32.totalorder %s854_s26, %s584_s21  ;;  %p589_p7 = scmp.lt.u32.totalorder %s854_s26, %s906_s3 }
 0x1d6   : > { %p590_p3 = scmp.lt.u32.totalorder %s588_s19, %s584_s21  ;;  %p592_p11 = scmp.lt.u32.totalorder %s584_s21, %s854_s26 }
 0x1d7   : > { %p586_p4 = pnand %p585_p10, %p784_p13 }
 0x1d8   : > { %p591_p2 = por %p590_p3, %p589_p7 }
 0x1d9   : > { %p587_p1 = pneg %p586_p4 }
 0x1da   : > { %p593_p6 = por %p592_p11, %p591_p2 }
 0x1dc   : > { %p594_p8 = pnand %p593_p6, %p587_p1 }
 0x1de   : > { %597 = shalt.err (!%p594_p8)
}
 0x1df   : > { %443 = dma.vmem_to_hbm [thread:$0]  (%p784_p13), %s856_s9, 16, %s854_s26, %s318_s30  }
 0x1e0 PF: > { %s342_s22 = sand.u32 1, %s636_s12   ;;  %p925_p9 = scmp.ne.s32.totalorder %s914_s23, 0 }
 0x1e1   : > { %p926_p12 = scmp.ge.s32.totalorder %s656_s17, 2  ;;  %s343_s24 = scalar_lea.sflag [#allocation5], %s342_s22 }
 0x1e3   : > { %p454_p0 = pnand %p926_p12, %p925_p9 }
 0x1e5   : > { %631 = dma.done.wait (!%p454_p0), %s343_s24, 16  }
 0x1e6   : > { %633 = vsyncadd (!%p454_p0), %s343_s24, 4294967280  ;;  %s20_s17 = sadd.s32 1, %s656_s17   ;;  %s927_s12 = smov %s640_s13 }
 0x1e7   : > { %p17_p5 = scmp.ge.s32.totalorder %s20_s17, 4   ;;  %s928_s13 = smov %s644_s14 }
 0x1e8   : > { %s929_s14 = smov %s792_s5  ;;  %s930_s15 = smov %s652_s16 }
 0x1e9   : > { %s931_s16 = smov %s933_s28  ;;  %19 = sbr.rel (!%p17_p5) target bundleno = 7 (0x7), region = 89 }
 0x1f0   :  { %347 = vsyncpa [#allocation4], 1 }
 0x1f1   :  { %349 = vsyncpa [#allocation4 + $0x1], 1 }
 0x1f2   :  { %350 = vsyncpa [#allocation7], 1 }
 0x1f3   :  { %351 = vsyncpa [#allocation5], 1 }
 0x1f4   :  { %353 = vsyncpa [#allocation5 + $0x1], 1 }

</bundles_post_ra>
